<compile_context>
chip_gen: v6e
topology: v6e:2x2x1
jax: 0.10.0
libtpu: 0.0.40
codegen_flags: <defaults>
</compile_context>

<pallas_src>
import math

import numpy as np

import jax
import jax.numpy as jnp
from jax import lax
from jax.experimental import pallas as pl
from jax.experimental.pallas import tpu as pltpu


def _round_up(x, m):
    return ((x + m - 1) // m) * m


def decoder_kernel(x_ref, w1_ref, b1_ref, w2_ref, b2_ref, o_ref):
    """One row tile of the 2-layer MLP, with rows on the lane axis of the output.

    x_ref : (tile_m, latent_dim) f32   activations, rows on sublanes
    w1_ref: (nhidden, latent_dim) f32  torch nn.Linear layout (out, in)
    b1_ref: (nhidden, 1)          f32
    w2_ref: (obs_dim, nhidden)    f32  torch nn.Linear layout (out, in)
    b2_ref: (obs_dim, 1)          f32
    o_ref : (obs_dim, tile_m)     f32  rows on lanes -> dense stores/writeback
    """
    x = x_ref[...]                                            # (tile_m, latent_dim)

    # fc1: h[j, m] = sum_k W1[j, k] * x[m, k]  -- contract the shared last dim
    # (A @ B^T on the MXU, same path as attention's Q @ K^T).  Result has the
    # row index m on lanes, so everything downstream is lane-dense.
    h = lax.dot_general(
        w1_ref[...], x, (((1,), (1,)), ((), ())),
        preferred_element_type=jnp.float32,
        precision=lax.Precision.HIGHEST)                      # (nhidden, tile_m)
    h = jnp.maximum(h + b1_ref[...], 0.0)                     # bias + ReLU (VPU)

    # fc2: standard (obs_dim, nhidden) @ (nhidden, tile_m) matmul.
    out = lax.dot_general(
        w2_ref[...], h, (((1,), (0,)), ((), ())),
        preferred_element_type=jnp.float32,
        precision=lax.Precision.HIGHEST)                      # (obs_dim, tile_m)

    o_ref[...] = (out + b2_ref[...]).astype(o_ref.dtype)


def decoder_forward(z, w1, b1, w2, b2, *, max_tile_m=4096):
    """Pallas version of Decoder.forward.

    z : (..., latent_dim) float32
    w1: (nhidden, latent_dim)  -- torch nn.Linear weight layout (out, in)
    b1: (nhidden,)
    w2: (obs_dim, nhidden)
    b2: (obs_dim,)
    returns (..., obs_dim) float32
    """
    latent_dim = z.shape[-1]
    nhidden = w1.shape[0]
    obs_dim = w2.shape[0]
    lead_shape = z.shape[:-1]
    M = 1
    for d in lead_shape:
        M *= int(d)

    # f32 activations straight into the kernel: no cast, no pad.
    x = z.reshape(M, latent_dim)

    if M <= 256:
        # Tiny input: a single full-extent block (full dims are exempt from the
        # (8,128) divisibility rule) -- no padding, one grid step.
        tile_m = M
    else:
        # Large row tiles amortize the ~0.35us/step pipeline overhead; keep at
        # least 2 grid steps so both v7x TensorCores get work; multiples of 128
        # keep the (unequal-to-full) block dims legal and the tail block masked.
        tile_m = min(max_tile_m, _round_up(pl.cdiv(M, 2), 128))
    grid = (pl.cdiv(M, tile_m),)

    b1r = b1.reshape(nhidden, 1).astype(jnp.float32)
    b2r = b2.reshape(obs_dim, 1).astype(jnp.float32)

    flops = 2 * M * (latent_dim * nhidden + nhidden * obs_dim)
    bytes_accessed = 4 * (M * latent_dim + M * obs_dim
                          + nhidden * latent_dim + nhidden
                          + obs_dim * nhidden + obs_dim)

    out_t = pl.pallas_call(
        decoder_kernel,
        grid=grid,
        in_specs=[
            # Activations: rows tiled along the grid.
            pl.BlockSpec((tile_m, latent_dim), lambda i: (i, 0)),
            # Parameters: full-array blocks with constant index maps -> one
            # resident VMEM copy reused across every grid step (no per-step DMA).
            pl.BlockSpec((nhidden, latent_dim), lambda i: (0, 0)),
            pl.BlockSpec((nhidden, 1), lambda i: (0, 0)),
            pl.BlockSpec((obs_dim, nhidden), lambda i: (0, 0)),
            pl.BlockSpec((obs_dim, 1), lambda i: (0, 0)),
        ],
        # Rows live on the lane axis of the output -> lane-dense vector stores
        # and a dense, contiguous writeback DMA (obs_dim=2 on lanes would give
        # 2/128-lane masked partial stores instead).
        out_specs=pl.BlockSpec((obs_dim, tile_m), lambda i: (0, i)),
        out_shape=jax.ShapeDtypeStruct((obs_dim, M), jnp.float32),
        compiler_params=pltpu.CompilerParams(
            dimension_semantics=("parallel",)),   # shards row tiles across v7x TCs
        cost_estimate=pl.CostEstimate(
            flops=flops, transcendentals=0, bytes_accessed=bytes_accessed),
    )(x, w1.astype(jnp.float32), b1r, w2.astype(jnp.float32), b2r)

    # Tiny transpose back to row-major (M, obs_dim): layout plumbing only.
    return out_t.T.reshape(*lead_shape, obs_dim)


# ----------------------------------------------------------------------------
# Demo / correctness check.
# ----------------------------------------------------------------------------
if __name__ == "__main__":
    latent_dim, obs_dim, nhidden = 4, 2, 20

    key = jax.random.PRNGKey(0)
    kw1, kb1, kw2, kb2, kz1, kz2 = jax.random.split(key, 6)

    def torch_linear_init(kw, kb, fan_in, fan_out):
        # torch.nn.Linear-style init: uniform(+-1/sqrt(fan_in)),
        # weight stored as (out_features, in_features).
        bound = 1.0 / math.sqrt(fan_in)
        w = jax.random.uniform(kw, (fan_out, fan_in), jnp.float32, -bound, bound)
        b = jax.random.uniform(kb, (fan_out,), jnp.float32, -bound, bound)
        return w, b

    w1, b1 = torch_linear_init(kw1, kb1, latent_dim, nhidden)
    w2, b2 = torch_linear_init(kw2, kb2, nhidden, obs_dim)

    # Small demo shape (batch=2, seq=8, latent_dim=4): single grid step.
    z_small = jax.random.normal(kz1, (2, 8, latent_dim), jnp.float32)
    out_small = jax.block_until_ready(decoder_forward(z_small, w1, b1, w2, b2))
    assert out_small.shape == (2, 8, obs_dim), out_small.shape

    # Larger shape exercising the multi-step parallel grid (M=8192 -> 2 tiles).
    z_big = jax.random.normal(kz2, (4, 2048, latent_dim), jnp.float32)
    out_big = jax.block_until_ready(decoder_forward(z_big, w1, b1, w2, b2))
    assert out_big.shape == (4, 2048, obs_dim), out_big.shape

    # Float64 numpy reference mirroring the PyTorch module exactly.
    w1n, b1n = np.asarray(w1, np.float64), np.asarray(b1, np.float64)
    w2n, b2n = np.asarray(w2, np.float64), np.asarray(b2, np.float64)

    def reference(z):
        zn = np.asarray(z, np.float64)
        h = np.maximum(zn @ w1n.T + b1n, 0.0)
        return h @ w2n.T + b2n

    for z, out in ((z_small, out_small), (z_big, out_big)):
        ref = reference(z)
        err = float(np.max(np.abs(np.asarray(out, np.float64) - ref)))
        # Observed error with f32 (HIGHEST-precision) MXU dots is ~1e-6; the
        # gate is left with margin only to tolerate backend precision modes.
        assert err < 1e-2, err

    print("KERNEL_OK")
</pallas_src>

<mosaic_0001>
module attributes {stable_mosaic.version = 11 : i64} {
  func.func @decoder_kernel(%arg0: i32, %arg1: memref<16x4xf32, #tpu.memory_space<vmem>>, %arg2: memref<20x4xf32, #tpu.memory_space<vmem>>, %arg3: memref<20x1xf32, #tpu.memory_space<vmem>>, %arg4: memref<2x20xf32, #tpu.memory_space<vmem>>, %arg5: memref<2x1xf32, #tpu.memory_space<vmem>>, %arg6: memref<2x16xf32, #tpu.memory_space<vmem>>) attributes {dimension_semantics = [#tpu.dimension_semantics<parallel>], iteration_bounds = array<i64: 1>, scalar_prefetch = 0 : i64, scratch_operands = 0 : i64, tpu.core_type = #tpu.core_type<tc>, window_params = [{transform_indices = @transform_0, window_bounds = array<i64: 16, 4>}, {pipeline_mode = #tpu.pipeline_mode<synchronous>, transform_indices = @transform_1, window_bounds = array<i64: 20, 4>}, {pipeline_mode = #tpu.pipeline_mode<synchronous>, transform_indices = @transform_2, window_bounds = array<i64: 20, 1>}, {pipeline_mode = #tpu.pipeline_mode<synchronous>, transform_indices = @transform_3, window_bounds = array<i64: 2, 20>}, {pipeline_mode = #tpu.pipeline_mode<synchronous>, transform_indices = @transform_4, window_bounds = array<i64: 2, 1>}, {transform_indices = @transform_5, window_bounds = array<i64: 2, 16>}]} {
    %c0 = arith.constant 0 : index
    %c0_0 = arith.constant 0 : index
    %0 = vector.load %arg1[%c0, %c0_0] : memref<16x4xf32, #tpu.memory_space<vmem>>, vector<16x4xf32>
    %c0_1 = arith.constant 0 : index
    %c0_2 = arith.constant 0 : index
    %1 = vector.load %arg2[%c0_1, %c0_2] : memref<20x4xf32, #tpu.memory_space<vmem>>, vector<20x4xf32>
    %cst = arith.constant dense<0.000000e+00> : vector<20x16xf32>
    %2 = tpu.matmul %1, %0, %cst {dimension_numbers = #tpu.dot_dimension_numbers<[1], [1], [0], [0], [0, 0, 1, 0], [], []>, precision = #tpu.contract_precision<fp32>} : vector<20x4xf32>, vector<16x4xf32>, vector<20x16xf32> -> vector<20x16xf32>
    %c0_3 = arith.constant 0 : index
    %c0_4 = arith.constant 0 : index
    %3 = vector.load %arg3[%c0_3, %c0_4] : memref<20x1xf32, #tpu.memory_space<vmem>>, vector<20x1xf32>
    %4 = vector.broadcast %3 : vector<20x1xf32> to vector<20x16xf32>
    %5 = arith.addf %2, %4 : vector<20x16xf32>
    %cst_5 = arith.constant 0.000000e+00 : f32
    %6 = vector.broadcast %cst_5 : f32 to vector<20x16xf32>
    %7 = arith.maximumf %5, %6 : vector<20x16xf32>
    %c0_6 = arith.constant 0 : index
    %c0_7 = arith.constant 0 : index
    %8 = vector.load %arg4[%c0_6, %c0_7] : memref<2x20xf32, #tpu.memory_space<vmem>>, vector<2x20xf32>
    %cst_8 = arith.constant dense<0.000000e+00> : vector<2x16xf32>
    %9 = tpu.matmul %8, %7, %cst_8 {dimension_numbers = #tpu.dot_dimension_numbers<[1], [0], [0], [1], [0, 0, 1, 1], [], []>, precision = #tpu.contract_precision<fp32>} : vector<2x20xf32>, vector<20x16xf32>, vector<2x16xf32> -> vector<2x16xf32>
    %c0_9 = arith.constant 0 : index
    %c0_10 = arith.constant 0 : index
    %10 = vector.load %arg5[%c0_9, %c0_10] : memref<2x1xf32, #tpu.memory_space<vmem>>, vector<2x1xf32>
    %11 = vector.broadcast %10 : vector<2x1xf32> to vector<2x16xf32>
    %12 = arith.addf %9, %11 : vector<2x16xf32>
    %c0_11 = arith.constant 0 : index
    %c0_12 = arith.constant 0 : index
    %13 = vector.load %arg6[%c0_11, %c0_12] : memref<2x16xf32, #tpu.memory_space<vmem>>, vector<2x16xf32>
    tpu.vector_store %arg6[%c0_11, %c0_12], %12 {strides = array<i32>} : memref<2x16xf32, #tpu.memory_space<vmem>>, vector<2x16xf32>,
    return
  }
  func.func @transform_0(%arg0: i32) -> (i32, i32) {
    %c0_i32 = arith.constant 0 : i32
    %c0_i32_0 = arith.constant 0 : i32
    return %arg0, %c0_i32 : i32, i32
  }
  func.func @transform_1(%arg0: i32) -> (i32, i32) {
    %c0_i32 = arith.constant 0 : i32
    %c0_i32_0 = arith.constant 0 : i32
    %c0_i32_1 = arith.constant 0 : i32
    return %c0_i32, %c0_i32_0 : i32, i32
  }
  func.func @transform_2(%arg0: i32) -> (i32, i32) {
    %c0_i32 = arith.constant 0 : i32
    %c0_i32_0 = arith.constant 0 : i32
    %c0_i32_1 = arith.constant 0 : i32
    return %c0_i32, %c0_i32_0 : i32, i32
  }
  func.func @transform_3(%arg0: i32) -> (i32, i32) {
    %c0_i32 = arith.constant 0 : i32
    %c0_i32_0 = arith.constant 0 : i32
    %c0_i32_1 = arith.constant 0 : i32
    return %c0_i32, %c0_i32_0 : i32, i32
  }
  func.func @transform_4(%arg0: i32) -> (i32, i32) {
    %c0_i32 = arith.constant 0 : i32
    %c0_i32_0 = arith.constant 0 : i32
    %c0_i32_1 = arith.constant 0 : i32
    return %c0_i32, %c0_i32_0 : i32, i32
  }
  func.func @transform_5(%arg0: i32) -> (i32, i32) {
    %c0_i32 = arith.constant 0 : i32
    %c0_i32_0 = arith.constant 0 : i32
    return %c0_i32, %arg0 : i32, i32
  }
}

</mosaic_0001>

<bundles_post_ra>
// kernel: tpu_custom_call.1
= control target key start
LH: loop header
LB: loop body
LE: loop exit
PB: predicated region body
PF: predicated region fallthrough
CT: control target
= control target key end

     0   :  { %vm44_vm0 = vcmask 31744   ;;  %v1325_v3 = vmov 0.0   ;;  %vm1326_vm1 = vmmov 0   ;;  %v1327_v21 = vmov 0   ;;  %s1537_s0 = inlined_call_operand.vmem [shape: f32[16,4], index: 0, kind: input, shape index: {}]   ;;  %s1538_s1 = inlined_call_operand.vmem [shape: f32[20,4], index: 1, kind: input, shape index: {}]   ;;  %s1539_s2 = inlined_call_operand.vmem [shape: f32[20,1], index: 2, kind: input, shape index: {}]   ;;  %s1540_s3 = inlined_call_operand.vmem [shape: f32[2,20], index: 3, kind: input, shape index: {}]   ;;  %s1541_s4 = inlined_call_operand.vmem [shape: f32[2,1], index: 4, kind: input, shape index: {}]   ;;  %s1542_s5 = inlined_call_operand.hbm [shape: f32[2,16], index: 5, kind: output, shape index: {}]  }
   0x1   :  { %v22_v0 = vld [vmem:[%s1537_s0 + $0x8] sm:$0xff]  ;;  %v21_v1 = vld [vmem:[%s1537_s0] sm:$0xff]  ;;  %1165 = vmatprep.subr.mxu0 %v1325_v3  ;;  %1169 = vmatprep.mubr.msk.f32.mxu0 %vm1326_vm1, %v1325_v3  ;;  %v25_v8 = vld [vmem:[%s1538_s1 + $0x10] sm:$0xf] }
   0x2   :  { %v23_v2 = vld [vmem:[%s1538_s1] sm:$0xff]  ;;  %v58_v4 = vsel %vm44_vm0, %v22_v0, 0  ;;  %v55_v5 = vsel %vm44_vm0, %v21_v1, 0  ;;  %v24_v7 = vld [vmem:[%s1538_s1 + $0x8] sm:$0xff]  ;;  %1178 = vmatprep.subr.mxu1 %v1325_v3  ;;  %1182 = vmatprep.mubr.msk.f32.mxu1 %vm1326_vm1, %v1325_v3  ;;  %v52_v14 = vsel %vm44_vm0, %v25_v8, 0 }
   0x3   :  { %v46_v6 = vsel %vm44_vm0, %v23_v2, 0  ;;  %v1380_v9 = vand.u32 4294901760, %v58_v4  ;;  %v1382_v10 = vand.u32 4294901760, %v55_v5  ;;  %v49_v12 = vsel %vm44_vm0, %v24_v7, 0  ;;  %v28_v15 = vld [vmem:[%s1539_s2 + $0x10] sm:$0xf]  ;;  %1302 = vset.pattern.permute.xlu1 %v1327_v21 }
   0x4   :  { %v1385_v11 = vand.u32 4294901760, %v46_v6  ;;  %v1390_v13 = vand.u32 4294901760, %v49_v12  ;;  %v26_v16 = vld [vmem:[%s1539_s2] sm:$0xff]  ;;  %v1405_v20 = vand.u32 4294901760, %v52_v14 }
   0x5   :  { %1166 = vmatpush3.xpose.msra.mxu0 %v1380_v9  ;;  %v187_v18 = vsub.f32 %v58_v4, %v1380_v9  ;;  %v194_v19 = vsub.f32 %v55_v5, %v1382_v10 }
   0x6   :  { %v1401_v17 = vsub.f32 %v46_v6, %v1385_v11 }
   0x7   :  { %10 = vsyncpa [#allocation3], 0  ;;  %1167 = vmatprep.subr.mxu0 %v1325_v3  ;;  %v1409_v22 = vsub.f32 %v49_v12, %v1390_v13  ;;  %1301 = vset.pattern.permute.xlu0 %v1327_v21  ;;  %v188_v24 = vand.u32 4294901760, %v187_v18  ;;  %v195_v25 = vand.u32 4294901760, %v194_v19  ;;  %v1413_v26 = vsub.f32 %v52_v14, %v1405_v20  ;;  %v27_v28 = vld [vmem:[%s1539_s2 + $0x8] sm:$0xff] }
   0x8   :  { %v129_v23 = vand.u32 4294901760, %v1401_v17  ;;  %41 = vperm.xlu0 %1301, %v28_v15   ;;  %31 = vperm.xlu1 %1302, %v26_v16   ;;  %v609_v29 = vld [vmem:[%s1541_s4] sm:$0x3]  ;;  %vm615_vm2 = vcmask 162816   ;;  %vm619_vm3 = vcmask 1043456   ;;  %vm1095_vm4 = vcmask 123904  }
   0x9   :  { %v139_v27 = vand.u32 4294901760, %v1409_v22  ;;  %1168 = vmatpush3.xpose.msra.mxu0 %v1382_v10  ;;  %v189_v31 = vsub.f32 %v187_v18, %v188_v24  ;;  %v196_v32 = vsub.f32 %v194_v19, %v195_v25  ;;  %v149_v33 = vand.u32 4294901760, %v1413_v26  ;;  %v608_v8 = vld [vmem:[%s1540_s3] sm:$0x3]  ;;  %s1328_s3 = smov [#allocation2]  }
   0xa   :  { %v130_v30 = vsub.f32 %v1401_v17, %v129_v23  ;;  %1191 = vmatprep.subr.mxu0 %v1325_v3  ;;  %v617_v16 = vsel %vm615_vm2, %v608_v8, 0  ;;  %s1103_s9 = sshll.u32 %s1328_s3, 4  ;;  %s1104_s9 = int_to_ptr.vmem [resolvable:$true] %s1103_s9 }
   0xb   :  { %v140_v34 = vsub.f32 %v1409_v22, %v139_v27  ;;  %v190_v36 = vand.u32 4294901760, %v189_v31  ;;  %v197_v38 = vand.u32 4294901760, %v196_v32  ;;  %v150_v39 = vsub.f32 %v1413_v26, %v149_v33  ;;  %s1303_s10 = scalar_lea.vmem %s1104_s9, 32  ;;  %p1308_p1 = scmp.lt.s32.totalorder %s1104_s9, %s1104_s9 }
   0xc   :  { %v131_v35 = vand.u32 4294901760, %v130_v30  ;;  %36 = vperm.xlu0 %1301, %v27_v28   ;;  %612 = vperm.xlu1 %1302, %v609_v29   ;;  %p1304_p0 = scmp.ne.s32.totalorder %s1104_s9, %s1303_s10  ;;  %p1309_p2 = scmp.lt.s32.totalorder %s1303_s10, %s1303_s10 }
   0xd   :  { %1179 = vmatpush3.xpose.msra.mxu1 %v190_v36  ;;  %v141_v37 = vand.u32 4294901760, %v140_v34  ;;  %v151_v40 = vand.u32 4294901760, %v150_v39 }
   0xe   :  { %1170 = vmatmul.mubr.f32.vlgmr.msra.gmra.mxu0 %v131_v35  ;;  %1180 = vmatprep.subr.mxu1 %v1325_v3  ;;  %p1310_p3 = por %p1309_p2, %p1308_p1 }
   0xf   :  { %1172 = vmatprep.mubr.msk.f32.mxu0 %vm1326_vm1, %v1325_v3  ;;  %1192 = vmatpush3.xpose.msra.mxu0 %v187_v18 }
  0x10   :  { %1193 = vmatprep.subr.mxu0 %v1325_v3  ;;  %p1311_p4 = pnand %p1310_p3, %p1304_p0 }
  0x11   :  { %1181 = vmatpush3.xpose.msra.mxu1 %v197_v38 }
  0x12   :  { %1173 = vmatmul.mubr.f32.gmra.mxu0 %v141_v37  ;;  %1204 = vmatprep.subr.mxu1 %v1325_v3 }
  0x13   :  { %1175 = vmatprep.mubr.msk.f32.mxu0 %vm1326_vm1, %v1325_v3  ;;  %1194 = vmatpush3.xpose.msra.mxu0 %v194_v19 }
  0x14   :  { %1183 = vmatmul.mubr.f32.vlgmr.msra.gmra.mxu1 %v1385_v11  ;;  %1217 = vmatprep.subr.mxu0 %v1325_v3 }
  0x15   :  { %1185 = vmatprep.mubr.msk.f32.mxu1 %vm1326_vm1, %v1325_v3  ;;  %1205 = vmatpush3.xpose.msra.mxu1 %v1380_v9 }
  0x16   :  { %1176 = vmatmul.mubr.f32.gmra.mxu0 %v151_v40  ;;  %1206 = vmatprep.subr.mxu1 %v1325_v3 }
  0x17   :  { %1195 = vmatprep.mubr.msk.f32.mxu0 %vm1326_vm1, %v1325_v3 }
  0x18   :  { %1186 = vmatmul.mubr.f32.gmra.mxu1 %v1390_v13 }
  0x19   :  { %1188 = vmatprep.mubr.msk.f32.mxu1 %vm1326_vm1, %v1325_v3  ;;  %1207 = vmatpush3.xpose.msra.mxu1 %v1382_v10 }
  0x1a   :  { %1196 = vmatmul.mubr.f32.vlgmr.msra.gmra.mxu0 %v1401_v17  ;;  %1230 = vmatprep.subr.mxu1 %v1325_v3 }
  0x1b   :  { %1198 = vmatprep.mubr.msk.f32.mxu0 %vm1326_vm1, %v1325_v3  ;;  %1218 = vmatpush3.xpose.msra.mxu0 %v188_v24  ;;  %v1493_v24 = vand.u32 4294901760, %v617_v16 }
  0x1c   :  { %1189 = vmatmul.mubr.f32.gmra.mxu1 %v1405_v20  ;;  %1219 = vmatprep.subr.mxu0 %v1325_v3 }
  0x1d   :  { %1208 = vmatprep.mubr.msk.f32.mxu1 %vm1326_vm1, %v1325_v3 }
  0x1e   :  { %1199 = vmatmul.mubr.f32.gmra.mxu0 %v1409_v22 }
  0x1f   :  { %1201 = vmatprep.mubr.msk.f32.mxu0 %vm1326_vm1, %v1325_v3  ;;  %1220 = vmatpush3.xpose.msra.mxu0 %v195_v25 }
  0x20   :  { %1209 = vmatmul.mubr.f32.vlgmr.msra.gmra.mxu1 %v129_v23  ;;  %1243 = vmatprep.subr.mxu0 %v1325_v3 }
  0x21   :  { %1211 = vmatprep.mubr.msk.f32.mxu1 %vm1326_vm1, %v1325_v3  ;;  %1231 = vmatpush3.xpose.msra.mxu1 %v1380_v9 }
  0x22   :  { %1202 = vmatmul.mubr.f32.gmra.mxu0 %v1413_v26  ;;  %1232 = vmatprep.subr.mxu1 %v1325_v3 }
  0x23   :  { %1221 = vmatprep.mubr.msk.f32.mxu0 %vm1326_vm1, %v1325_v3 }
  0x24   :  { %1212 = vmatmul.mubr.f32.gmra.mxu1 %v139_v27 }
  0x25   :  { %1214 = vmatprep.mubr.msk.f32.mxu1 %vm1326_vm1, %v1325_v3  ;;  %1233 = vmatpush3.xpose.msra.mxu1 %v1382_v10 }
  0x26   :  { %1222 = vmatmul.mubr.f32.vlgmr.msra.gmra.mxu0 %v1385_v11  ;;  %1252 = vmatprep.subr.mxu1 %v1325_v3 }
  0x27   :  { %1224 = vmatprep.mubr.msk.f32.mxu0 %vm1326_vm1, %v1325_v3 }
  0x28   :  { %1215 = vmatmul.mubr.f32.gmra.mxu1 %v149_v33  ;;  %v1496_v33 = vsub.f32 %v617_v16, %v1493_v24 }
  0x29   :  { %1234 = vmatprep.mubr.msk.f32.mxu1 %vm1326_vm1, %v1325_v3 }
  0x2a   :  { %1225 = vmatmul.mubr.f32.gmra.mxu0 %v1390_v13 }
  0x2b   :  { %1227 = vmatprep.mubr.msk.f32.mxu0 %vm1326_vm1, %v1325_v3 }
  0x2c   :  { %1235 = vmatmul.mubr.f32.vlgmr.msra.gmra.mxu1 %v1385_v11 }
  0x2d   :  { %1237 = vmatprep.mubr.msk.f32.mxu1 %vm1326_vm1, %v1325_v3 }
  0x2e   :  { %1228 = vmatmul.mubr.f32.gmra.mxu0 %v1405_v20 }
  0x2f   :  { %1249 = vmatprep.mubr.msk.f32.mxu0 %vm1326_vm1, %v1325_v3 }
  0x30   :  { %1238 = vmatmul.mubr.f32.gmra.mxu1 %v1390_v13 }
  0x31   :  { %1240 = vmatprep.mubr.msk.f32.mxu1 %vm1326_vm1, %v1325_v3 }
  0x34   :  { %1241 = vmatmul.mubr.f32.gmra.mxu1 %v1405_v20 }
  0x35   :  { %1258 = vmatprep.mubr.msk.f32.mxu1 %vm1326_vm1, %v1325_v3 }
  0x83   :  { %v42_v53 = vpop.permute.xlu0 %41  ;;  %v32_v57 = vpop.permute.xlu1 %31 }
  0x87   :  { %v37_v62 = vpop.permute.xlu0 %36 }
  0xce   :  { %v133_v41 = vpop.f32.mrf.mxu0 }
  0xcf   :  { %v134_v61 = vadd.f32 %v133_v41, %v32_v57  ;;  %v693_v41 = vand.u32 4294901760, %v1496_v33 }
  0xd0   :  { %v1171_v42 = vpop.f32.mrf.mxu0 }
  0xd2   :  { %v143_v43 = vpop.f32.mrf.mxu0 }
  0xd3   :  { %v144_v2 = vadd.f32 %v143_v43, %v37_v62 }
  0xd4   :  { %v1174_v44 = vpop.f32.mrf.mxu0  ;;  %v234_v45 = vpop.f32.mrf.mxu1 }
  0xd5   :  { %v235_v5 = vadd.f32 %v234_v45, %v134_v61 }
  0xd6   :  { %v153_v46 = vpop.f32.mrf.mxu0  ;;  %v1184_v47 = vpop.f32.mrf.mxu1 }
  0xd7   :  { %v154_v11 = vadd.f32 %v153_v46, %v42_v53  ;;  %v694_v47 = vsub.f32 %v1496_v33, %v693_v41 }
  0xd8   :  { %v1177_v48 = vpop.f32.mrf.mxu0  ;;  %v240_v49 = vpop.f32.mrf.mxu1 }
  0xd9   :  { %v241_v12 = vadd.f32 %v240_v49, %v144_v2 }
  0xda   :  { %v322_v50 = vpop.f32.mrf.mxu0  ;;  %v1187_v51 = vpop.f32.mrf.mxu1 }
  0xdb   :  { %v323_v9 = vadd.f32 %v322_v50, %v235_v5 }
  0xdc   :  { %v1197_v52 = vpop.f32.mrf.mxu0  ;;  %v246_v54 = vpop.f32.mrf.mxu1 }
  0xdd   :  { %v247_v21 = vadd.f32 %v246_v54, %v154_v11  ;;  %v695_v52 = vand.u32 4294901760, %v694_v47 }
  0xde   :  { %v329_v55 = vpop.f32.mrf.mxu0  ;;  %v1190_v56 = vpop.f32.mrf.mxu1 }
  0xdf   :  { %v330_v17 = vadd.f32 %v329_v55, %v241_v12 }
  0xe0   :  { %v1200_v58 = vpop.f32.mrf.mxu0  ;;  %v411_v59 = vpop.f32.mrf.mxu1 }
  0xe1   :  { %v412_v14 = vadd.f32 %v411_v59, %v323_v9 }
  0xe2   :  { %v336_v60 = vpop.f32.mrf.mxu0  ;;  %v1210_v63 = vpop.f32.mrf.mxu1 }
  0xe3   :  { %v337_v27 = vadd.f32 %v336_v60, %v247_v21  ;;  %v613_v63 = vpop.permute.xlu1 %612 }
  0xe4   :  { %v1203_v0 = vpop.f32.mrf.mxu0  ;;  %v419_v1 = vpop.f32.mrf.mxu1 }
  0xe5   :  { %v420_v22 = vadd.f32 %v419_v1, %v330_v17 }
  0xe6   :  { %v504_v4 = vpop.f32.mrf.mxu0  ;;  %v1213_v6 = vpop.f32.mrf.mxu1 }
  0xe7   :  { %v505_v19 = vadd.f32 %v504_v4, %v412_v14 }
  0xe8   :  { %v1223_v7 = vpop.f32.mrf.mxu0  ;;  %v427_v10 = vpop.f32.mrf.mxu1 }
  0xe9   :  { %v428_v31 = vadd.f32 %v427_v10, %v337_v27 }
  0xea   :  { %v510_v13 = vpop.f32.mrf.mxu0  ;;  %v1216_v15 = vpop.f32.mrf.mxu1 }
  0xeb   :  { %v511_v28 = vadd.f32 %v510_v13, %v420_v22 }
  0xec   :  { %v1226_v18 = vpop.f32.mrf.mxu0  ;;  %v589_v20 = vpop.f32.mrf.mxu1 }
  0xed   :  { %v590_v25 = vadd.f32 %v589_v20, %v505_v19 }
  0xee   :  { %v516_v23 = vpop.f32.mrf.mxu0  ;;  %v1236_v26 = vpop.f32.mrf.mxu1 }
  0xef   :  { %v605_v34 = vmax.f32 %v590_v25, 0.0  ;;  %v517_v36 = vadd.f32 %v516_v23, %v428_v31 }
  0xf0   :  { %v1229_v29 = vpop.f32.mrf.mxu0  ;;  %v595_v30 = vpop.f32.mrf.mxu1 }
  0xf1   :  { %v596_v32 = vadd.f32 %v595_v30, %v511_v28  ;;  %v656_v42 = vand.u32 4294901760, %v605_v34 }
  0xf2   :  { %v1239_v35 = vpop.f32.mrf.mxu1 }
  0xf3   :  { %v606_v37 = vmax.f32 %v596_v32, 0.0  ;;  %v743_v48 = vsub.f32 %v605_v34, %v656_v42 }
  0xf4   :  { %v601_v38 = vpop.f32.mrf.mxu1 }
  0xf5   :  { %v1498_v39 = vand.u32 4294901760, %v606_v37  ;;  %v602_v40 = vadd.f32 %v601_v38, %v517_v36  ;;  %v744_v53 = vand.u32 4294901760, %v743_v48 }
  0xf6   :  { %v1242_v43 = vpop.f32.mrf.mxu1 }
  0xf7   :  { %v607_v44 = vmax.f32 %v602_v40, 0.0  ;;  %v736_v45 = vsub.f32 %v606_v37, %v1498_v39  ;;  %v745_v57 = vsub.f32 %v743_v48, %v744_v53 }
  0xf9   :  { %v621_v46 = vsel %vm619_vm3, %v607_v44, 0  ;;  %v737_v50 = vand.u32 4294901760, %v736_v45  ;;  %v746_v60 = vand.u32 4294901760, %v745_v57 }
  0xfa   :  { %v650_v49 = vand.u32 4294901760, %v621_v46 }
  0xfb   :  { %v738_v55 = vsub.f32 %v736_v45, %v737_v50 }
  0xfc   :  { %v729_v51 = vsub.f32 %v621_v46, %v650_v49  ;;  %1244 = vmatpush3.msra.mxu0 %v650_v49 }
  0xfd   :  { %1245 = vmatprep.subr.mxu0 %v1325_v3  ;;  %v739_v59 = vand.u32 4294901760, %v738_v55 }
  0xfe   :  { %v730_v54 = vand.u32 4294901760, %v729_v51  ;;  %1246 = vmatpush3.msra.mxu0 %v1498_v39 }
  0xff   :  { %1247 = vmatprep.subr.mxu0 %v1325_v3 }
 0x100   :  { %1248 = vmatpush3.msra.mxu0 %v656_v42  ;;  %v731_v56 = vsub.f32 %v729_v51, %v730_v54 }
 0x101   :  { %1250 = vmatmul.mubr.f32.vlgmr.msra.gmra.mxu0 %v695_v52  ;;  %1261 = vmatprep.subr.mxu0 %v1325_v3 }
 0x102   :  { %1262 = vmatpush3.msra.mxu0 %v729_v51  ;;  %v732_v58 = vand.u32 4294901760, %v731_v56  ;;  %1267 = vmatprep.mubr.msk.f32.mxu0 %vm1326_vm1, %v1325_v3 }
 0x103   :  { %1263 = vmatprep.subr.mxu0 %v1325_v3 }
 0x104   :  { %1253 = vmatpush3.msra.mxu1 %v732_v58  ;;  %1264 = vmatpush3.msra.mxu0 %v736_v45 }
 0x105   :  { %1254 = vmatprep.subr.mxu1 %v1325_v3  ;;  %1265 = vmatprep.subr.mxu0 %v1325_v3 }
 0x106   :  { %1255 = vmatpush3.msra.mxu1 %v739_v59  ;;  %1266 = vmatpush3.msra.mxu0 %v743_v48 }
 0x107   :  { %1256 = vmatprep.subr.mxu1 %v1325_v3  ;;  %1279 = vmatprep.subr.mxu0 %v1325_v3 }
 0x108   :  { %1257 = vmatpush3.msra.mxu1 %v746_v60  ;;  %1268 = vmatmul.mubr.f32.vlgmr.msra.gmra.mxu0 %v1496_v33 }
 0x109   :  { %1280 = vmatpush3.msra.mxu0 %v730_v54  ;;  %1259 = vmatmul.mubr.f32.vlgmr.msra.gmra.mxu1 %v1493_v24 }
 0x10a   :  { %1270 = vmatprep.subr.mxu1 %v1325_v3  ;;  %1281 = vmatprep.subr.mxu0 %v1325_v3 }
 0x10b   :  { %1271 = vmatpush3.msra.mxu1 %v650_v49  ;;  %1282 = vmatpush3.msra.mxu0 %v737_v50 }
 0x10c   :  { %1272 = vmatprep.subr.mxu1 %v1325_v3  ;;  %1283 = vmatprep.subr.mxu0 %v1325_v3 }
 0x10d   :  { %1273 = vmatpush3.msra.mxu1 %v1498_v39  ;;  %1284 = vmatpush3.msra.mxu0 %v744_v53 }
 0x10e   :  { %1274 = vmatprep.subr.mxu1 %v1325_v3  ;;  %1276 = vmatprep.mubr.msk.f32.mxu1 %vm1326_vm1, %v1325_v3 }
 0x10f   :  { %1275 = vmatpush3.msra.mxu1 %v656_v42  ;;  %1285 = vmatprep.mubr.msk.f32.mxu0 %vm1326_vm1, %v1325_v3 }
 0x110   :  { %1277 = vmatmul.mubr.f32.vlgmr.msra.gmra.mxu1 %v693_v41  ;;  %1288 = vmatprep.subr.mxu1 %v1325_v3 }
 0x111   :  { %1289 = vmatpush3.msra.mxu1 %v650_v49  ;;  %1286 = vmatmul.mubr.f32.vlgmr.msra.gmra.mxu0 %v1493_v24 }
 0x112   :  { %1290 = vmatprep.subr.mxu1 %v1325_v3  ;;  %1294 = vmatprep.mubr.msk.f32.mxu1 %vm1326_vm1, %v1325_v3 }
 0x113   :  { %1291 = vmatpush3.msra.mxu1 %v1498_v39 }
 0x114   :  { %1292 = vmatprep.subr.mxu1 %v1325_v3 }
 0x115   :  { %1293 = vmatpush3.msra.mxu1 %v656_v42 }
 0x116   :  { %1295 = vmatmul.mubr.f32.vlgmr.msra.gmra.mxu1 %v1493_v24 }
 0x1c1   :  { %v697_v61 = vpop.f32.mrf.mxu0 }
 0x1c2   :  { %v698_v1 = vadd.f32 %v697_v61, %v613_v63 }
 0x1c3   :  { %v1251_v62 = vpop.f32.mrf.mxu0 }
 0x1c8   :  { %v861_v0 = vpop.f32.mrf.mxu0 }
 0x1c9   :  { %v783_v2 = vpop.f32.mrf.mxu1 }
 0x1ca   :  { %v1269_v4 = vpop.f32.mrf.mxu0  ;;  %v784_v5 = vadd.f32 %v783_v2, %v698_v1 }
 0x1cb   :  { %v1260_v6 = vpop.f32.mrf.mxu1 }
 0x1cc   :  { %v862_v7 = vadd.f32 %v861_v0, %v784_v5 }
 0x1d0   :  { %v937_v8 = vpop.f32.mrf.mxu1 }
 0x1d1   :  { %v938_v9 = vadd.f32 %v937_v8, %v862_v7  ;;  %v1017_v10 = vpop.f32.mrf.mxu0 }
 0x1d2   :  { %v1278_v11 = vpop.f32.mrf.mxu1 }
 0x1d3   :  { %v1287_v12 = vpop.f32.mrf.mxu0  ;;  %v1018_v3 = vadd.f32 %v1017_v10, %v938_v9 }
 0x1d6   :  { %v1091_v13 = vpop.f32.mrf.mxu1 }
 0x1d7   :  { %v1092_v14 = vadd.f32 %v1091_v13, %v1018_v3 }
 0x1d8   :  { %v1296_v15 = vpop.f32.mrf.mxu1 }
 0x1d9   :  { %1096 = vst.msk [vmem:[#allocation2] sm:$0x3] %vm1095_vm4, %v1092_v14 }
 0x1da   :  { %1314 = shalt.err (!%p1311_p4)
}
 0x1db   :  { %1106 = dma.vmem_to_hbm [thread:$0]  %s1104_s9, 32, %s1542_s5, [#allocation3]  }
 0x1dc   :  { %1323 = dma.done.wait [#allocation3], 32  }
 0x1dd   :  { %1324 = vsyncadd [#allocation3], 4294967264 }
 0x1de   :  { %1110 = vsyncpa [#allocation3], 1 }

</bundles_post_ra>
